<compile_context>
chip_gen: v7x
topology: tpu7x:2x2x1
jax: 0.10.0
libtpu: 0.0.40
codegen_flags: <defaults>
</compile_context>

<pallas_src>
import jax
import jax.numpy as jnp
from jax.experimental import pallas as pl
from jax.experimental.pallas import tpu as pltpu


def _round_up(x, m):
    return ((x + m - 1) // m) * m


def _two_layer_kernel(x_ref, w1t_ref, w2t_ref, o_ref, acc_ref):
    """One (tm, D_out_p) output tile; grid axis 1 walks H in th-sized chunks.

    x_ref  : (tm, D_in_p)       activation tile (full D_in contraction per step)
    w1t_ref: (D_in_p, th)       W1^T chunk  -> hidden units [kh*th, (kh+1)*th)
    w2t_ref: (th, D_out_p)      W2^T chunk  -> same hidden units, all output cols
    o_ref  : (tm, D_out_p)      output tile
    acc_ref: (tm, D_out_p) f32  VMEM accumulator
    """
    kh = pl.program_id(1)

    @pl.when(kh == 0)
    def _():
        acc_ref[...] = jnp.zeros_like(acc_ref)

    # h = relu(x @ W1^T) for this block of hidden units.  The full D_in contraction
    # happens inside one grid step, so applying ReLU per H-tile is exact.
    h = jnp.dot(x_ref[...], w1t_ref[...], preferred_element_type=jnp.float32)
    h = jnp.maximum(h, 0.0)  # .clamp(min=0) on the f32 accumulator

    # acc += h @ W2^T chunk (f32 -> compute-dtype pack feeds the MXU, accumulate f32).
    acc_ref[...] += jnp.dot(h.astype(w2t_ref.dtype), w2t_ref[...],
                            preferred_element_type=jnp.float32)

    @pl.when(kh == pl.num_programs(1) - 1)
    def _():
        o_ref[...] = acc_ref[...].astype(o_ref.dtype)


def make_two_layer_net(w1, w2, *, compute_dtype=jnp.bfloat16,
                       tm_cap=512, th_cap=256,
                       vmem_budget_bytes=48 * 1024 * 1024):
    """w1: (H, D_in), w2: (D_out, H) — PyTorch nn.Linear layout, no bias.

    Pads / transposes / casts the weights ONCE and returns a jitted apply(x).
    Zero-padding is exact for this op (zero input columns / zero hidden units /
    sliced-off output columns contribute exactly 0)."""
    H, D_in = w1.shape
    D_out, H_w = w2.shape
    assert H == H_w, "w1/w2 hidden dims must match"

    itemsize = jnp.dtype(compute_dtype).itemsize
    sub = 16 if itemsize == 2 else 8

    D_in_p = _round_up(D_in, 128)
    H_p = _round_up(H, 128)
    D_out_p = _round_up(D_out, 128)

    # th in {128, 256, 512} so halving keeps a 128-multiple that divides H_p.
    th0 = min(th_cap, H_p)
    th0 = 512 if th0 >= 512 else (256 if th0 >= 256 else 128)
    H_p = _round_up(H_p, th0)

    # (in, out) layouts -> both matmuls are plain (m,k)x(k,n) MXU contractions
    # (no XLU transposes inside the kernel); done once, not per call.
    w1t = jnp.zeros((D_in_p, H_p), compute_dtype).at[:D_in, :H].set(
        w1.T.astype(compute_dtype))
    w2t = jnp.zeros((H_p, D_out_p), compute_dtype).at[:H, :D_out].set(
        w2.T.astype(compute_dtype))

    def _footprint(tm, th):
        return (2 * tm * D_in_p * itemsize        # x block (double-buffered)
                + 2 * D_in_p * th * itemsize      # W1^T block
                + 2 * th * D_out_p * itemsize     # W2^T block
                + 2 * tm * D_out_p * 4            # output block (<= f32)
                + tm * D_out_p * 4)               # f32 accumulator scratch

    def apply(x):
        N, D_in_x = x.shape
        assert D_in_x == D_in
        out_dtype = x.dtype

        # Per-call activation pad only (weights were padded once above).
        N_p = _round_up(N, sub)
        tm = max(sub, (min(tm_cap, N_p) // sub) * sub)
        th = th0
        # Shrink tiles until the double-buffered footprint fits a v7x-safe budget.
        while _footprint(tm, th) > vmem_budget_bytes:
            if tm > 256:
                tm //= 2
            elif th > 128:
                th //= 2
            elif tm > sub:
                tm = max(sub, tm // 2)
            else:
                break
        N_p = _round_up(N_p, tm)

        xp = jnp.zeros((N_p, D_in_p), compute_dtype).at[:N, :D_in].set(
            x.astype(compute_dtype))

        grid = (N_p // tm, H_p // th)

        flops = 2 * N_p * D_in_p * H_p + 2 * N_p * H_p * D_out_p
        # Actual streaming: x + output once; W1^T/W2^T once per M tile.
        bytes_accessed = int(xp.size * itemsize
                             + grid[0] * (w1t.size + w2t.size) * itemsize
                             + N_p * D_out_p * jnp.dtype(out_dtype).itemsize)

        # Raise the scoped-VMEM limit to the tile footprint (+headroom), never
        # below 32 MiB, capped at 56 MiB to leave headroom on v7x's 64 MiB VMEM.
        vmem_limit = int(min(max(_footprint(tm, th) + (4 << 20), 32 << 20),
                             56 << 20))

        out_p = pl.pallas_call(
            _two_layer_kernel,
            out_shape=jax.ShapeDtypeStruct((N_p, D_out_p), out_dtype),
            grid_spec=pltpu.PrefetchScalarGridSpec(
                num_scalar_prefetch=0,
                grid=grid,
                in_specs=[
                    pl.BlockSpec((tm, D_in_p), lambda m, kh: (m, 0)),   # x tile
                    pl.BlockSpec((D_in_p, th), lambda m, kh: (0, kh)),  # W1^T chunk
                    pl.BlockSpec((th, D_out_p), lambda m, kh: (kh, 0)),  # W2^T chunk
                ],
                out_specs=pl.BlockSpec((tm, D_out_p), lambda m, kh: (m, 0)),
                scratch_shapes=[pltpu.VMEM((tm, D_out_p), jnp.float32)],
            ),
            compiler_params=pltpu.CompilerParams(
                dimension_semantics=("parallel", "arbitrary"),
                vmem_limit_bytes=vmem_limit),
            cost_estimate=pl.CostEstimate(
                flops=flops, transcendentals=0, bytes_accessed=bytes_accessed),
        )(xp, w1t, w2t)

        if (N_p, D_out_p) != (N, D_out):
            out_p = out_p[:N, :D_out]
        return out_p

    return jax.jit(apply)


if __name__ == "__main__":
    # Small shapes consistent with the module: N=8, D_in=64, H=32, D_out=16.
    # (At these toy sizes launch overhead dominates; the structure above is aimed
    #  at production N/D_in/H/D_out where the single-pass W1 stream + bf16 MXU pay off.)
    N, D_in, H, D_out = 8, 64, 32, 16

    key = jax.random.PRNGKey(0)
    kx, k1, k2 = jax.random.split(key, 3)

    x = jax.random.normal(kx, (N, D_in), dtype=jnp.float32)
    # Deterministic weight init (uniform, kaiming-like scale), PyTorch (out, in) layout.
    bound1 = 1.0 / (D_in ** 0.5)
    bound2 = 1.0 / (H ** 0.5)
    w1 = jax.random.uniform(k1, (H, D_in), minval=-bound1, maxval=bound1,
                            dtype=jnp.float32)
    w2 = jax.random.uniform(k2, (D_out, H), minval=-bound2, maxval=bound2,
                            dtype=jnp.float32)

    net = make_two_layer_net(w1, w2)   # weights padded / transposed / cast once here
    y = net(x)
    jax.block_until_ready(y)

    # Reference 1: same bf16-operand / f32-accumulate recipe as the kernel (tight tol).
    xb = x.astype(jnp.bfloat16)
    w1b = w1.astype(jnp.bfloat16)
    w2b = w2.astype(jnp.bfloat16)
    h_ref = jnp.maximum(jnp.dot(xb, w1b.T, preferred_element_type=jnp.float32), 0.0)
    y_ref_bf16 = jnp.dot(h_ref.astype(jnp.bfloat16), w2b.T,
                         preferred_element_type=jnp.float32)
    # Reference 2: pure f32 semantics of the original module (loose tol, bf16 rounding).
    y_ref_f32 = jnp.maximum(x @ w1.T, 0.0) @ w2.T

    assert y.shape == (N, D_out)
    assert y.dtype == x.dtype
    assert jnp.allclose(y, y_ref_bf16, atol=1e-3, rtol=1e-3), \
        float(jnp.max(jnp.abs(y - y_ref_bf16)))
    assert jnp.allclose(y, y_ref_f32, atol=5e-2, rtol=5e-2), \
        float(jnp.max(jnp.abs(y - y_ref_f32)))

    print("KERNEL_OK")
</pallas_src>

<mosaic_0001>
module attributes {stable_mosaic.version = 11 : i64} {
  func.func @_two_layer_kernel(%arg0: i32, %arg1: i32, %arg2: memref<16x128xbf16, #tpu.memory_space<vmem>>, %arg3: memref<128x128xbf16, #tpu.memory_space<vmem>>, %arg4: memref<128x128xbf16, #tpu.memory_space<vmem>>, %arg5: memref<16x128xf32, #tpu.memory_space<vmem>>, %arg6: memref<16x128xf32, #tpu.memory_space<vmem>>) attributes {dimension_semantics = [#tpu.dimension_semantics<parallel>, #tpu.dimension_semantics<arbitrary>], iteration_bounds = array<i64: 1, 1>, scalar_prefetch = 0 : i64, scratch_operands = 1 : i64, tpu.core_type = #tpu.core_type<tc>, window_params = [{transform_indices = @transform_0, window_bounds = array<i64: 16, 128>}, {transform_indices = @transform_1, window_bounds = array<i64: 128, 128>}, {transform_indices = @transform_2, window_bounds = array<i64: 128, 128>}, {transform_indices = @transform_3, window_bounds = array<i64: 16, 128>}]} {
    %c0_i32 = arith.constant 0 : i32
    %0 = arith.cmpi eq, %arg1, %c0_i32 : i32
    %1 = arith.extui %0 : i1 to i32
    %c0_i32_0 = arith.constant 0 : i32
    %2 = arith.cmpi ne, %1, %c0_i32_0 : i32
    scf.if %2 {
      %cst_14 = arith.constant 0.000000e+00 : f32
      %17 = vector.broadcast %cst_14 : f32 to vector<16x128xf32>
      %c0_15 = arith.constant 0 : index
      %c0_16 = arith.constant 0 : index
      %18 = vector.load %arg6[%c0_15, %c0_16] : memref<16x128xf32, #tpu.memory_space<vmem>>, vector<16x128xf32>
      tpu.vector_store %arg6[%c0_15, %c0_16], %17 {strides = array<i32>} : memref<16x128xf32, #tpu.memory_space<vmem>>, vector<16x128xf32>,
    } else {
    }
    %c0 = arith.constant 0 : index
    %c0_1 = arith.constant 0 : index
    %3 = vector.load %arg2[%c0, %c0_1] : memref<16x128xbf16, #tpu.memory_space<vmem>>, vector<16x128xbf16>
    %c0_2 = arith.constant 0 : index
    %c0_3 = arith.constant 0 : index
    %4 = vector.load %arg3[%c0_2, %c0_3] : memref<128x128xbf16, #tpu.memory_space<vmem>>, vector<128x128xbf16>
    %cst = arith.constant dense<0.000000e+00> : vector<16x128xf32>
    %5 = tpu.matmul %3, %4, %cst {dimension_numbers = #tpu.dot_dimension_numbers<[1], [0], [0], [1], [0, 0, 1, 1], [], []>} : vector<16x128xbf16>, vector<128x128xbf16>, vector<16x128xf32> -> vector<16x128xf32>
    %cst_4 = arith.constant 0.000000e+00 : f32
    %6 = vector.broadcast %cst_4 : f32 to vector<16x128xf32>
    %7 = arith.maximumf %5, %6 : vector<16x128xf32>
    %c0_5 = arith.constant 0 : index
    %c0_6 = arith.constant 0 : index
    %8 = vector.load %arg6[%c0_5, %c0_6] : memref<16x128xf32, #tpu.memory_space<vmem>>, vector<16x128xf32>
    %9 = arith.truncf %7 : vector<16x128xf32> to vector<16x128xbf16>
    %c0_7 = arith.constant 0 : index
    %c0_8 = arith.constant 0 : index
    %10 = vector.load %arg4[%c0_7, %c0_8] : memref<128x128xbf16, #tpu.memory_space<vmem>>, vector<128x128xbf16>
    %cst_9 = arith.constant dense<0.000000e+00> : vector<16x128xf32>
    %11 = tpu.matmul %9, %10, %cst_9 {dimension_numbers = #tpu.dot_dimension_numbers<[1], [0], [0], [1], [0, 0, 1, 1], [], []>} : vector<16x128xbf16>, vector<128x128xbf16>, vector<16x128xf32> -> vector<16x128xf32>
    %12 = arith.addf %8, %11 : vector<16x128xf32>
    %c0_10 = arith.constant 0 : index
    %c0_11 = arith.constant 0 : index
    %13 = vector.load %arg6[%c0_10, %c0_11] : memref<16x128xf32, #tpu.memory_space<vmem>>, vector<16x128xf32>
    tpu.vector_store %arg6[%c0_10, %c0_11], %12 {strides = array<i32>} : memref<16x128xf32, #tpu.memory_space<vmem>>, vector<16x128xf32>,
    %c0_i32_12 = arith.constant 0 : i32
    %14 = arith.cmpi eq, %arg1, %c0_i32_12 : i32
    %15 = arith.extui %14 : i1 to i32
    %c0_i32_13 = arith.constant 0 : i32
    %16 = arith.cmpi ne, %15, %c0_i32_13 : i32
    scf.if %16 {
      %c0_14 = arith.constant 0 : index
      %c0_15 = arith.constant 0 : index
      %17 = vector.load %arg6[%c0_14, %c0_15] : memref<16x128xf32, #tpu.memory_space<vmem>>, vector<16x128xf32>
      %c0_16 = arith.constant 0 : index
      %c0_17 = arith.constant 0 : index
      %18 = vector.load %arg5[%c0_16, %c0_17] : memref<16x128xf32, #tpu.memory_space<vmem>>, vector<16x128xf32>
      tpu.vector_store %arg5[%c0_16, %c0_17], %17 {strides = array<i32>} : memref<16x128xf32, #tpu.memory_space<vmem>>, vector<16x128xf32>,
    } else {
    }
    return
  }
  func.func @transform_0(%arg0: i32, %arg1: i32) -> (i32, i32) {
    %c0_i32 = arith.constant 0 : i32
    %c0_i32_0 = arith.constant 0 : i32
    return %arg0, %c0_i32 : i32, i32
  }
  func.func @transform_1(%arg0: i32, %arg1: i32) -> (i32, i32) {
    %c0_i32 = arith.constant 0 : i32
    %c0_i32_0 = arith.constant 0 : i32
    return %c0_i32, %arg1 : i32, i32
  }
  func.func @transform_2(%arg0: i32, %arg1: i32) -> (i32, i32) {
    %c0_i32 = arith.constant 0 : i32
    %c0_i32_0 = arith.constant 0 : i32
    return %arg1, %c0_i32 : i32, i32
  }
  func.func @transform_3(%arg0: i32, %arg1: i32) -> (i32, i32) {
    %c0_i32 = arith.constant 0 : i32
    %c0_i32_0 = arith.constant 0 : i32
    return %arg0, %c0_i32 : i32, i32
  }
}

</mosaic_0001>

<bundles_post_ra>
// kernel: apply.1
= control target key start
LH: loop header
LB: loop body
LE: loop exit
PB: predicated region body
PF: predicated region fallthrough
CT: control target
= control target key end

     0   :  { %8 = vsyncpa [#allocation4], 0  ;;  %s494_s0 = inlined_call_operand.vmem [shape: bf16[16,128], index: 0, kind: input, shape index: {}]   ;;  %s495_s1 = inlined_call_operand.hbm [shape: bf16[128,128], index: 1, kind: input, shape index: {}]   ;;  %s496_s2 = inlined_call_operand.hbm [shape: bf16[128,128], index: 2, kind: input, shape index: {}]   ;;  %s497_s3 = inlined_call_operand.vmem [shape: f32[16,128], index: 3, kind: output, shape index: {}]  }
   0x1   :  { %9 = vsyncpa [#allocation6], 0  ;;  %s435_s12 = smov [#allocation3]   ;;  %s387_s16 = scalar_lea.hbm %s495_s1, 1024 }
   0x2   :  { %s17_s13 = sshll.u32 %s435_s12, 4  ;;  %p388_p0 = scmp.ne.s32.totalorder %s495_s1, %s387_s16  ;;  %s18_s13 = int_to_ptr.vmem [resolvable:$true] %s17_s13 }
   0x3   :  { %p391_p1 = scmp.lt.u32.totalorder %s387_s16, %s495_s1 }
   0x5   :  { %p393_p2 = pnand %p391_p1, %p388_p0 }
   0x7   :  { %396 = shalt.err (!%p393_p2)
}
   0x8   :  { %s397_s21 = scalar_lea.vmem %s18_s13, 1024  ;;  %p402_p4 = scmp.lt.s32.totalorder %s18_s13, %s18_s13 }
   0x9   :  { %p398_p3 = scmp.ne.s32.totalorder %s18_s13, %s397_s21  ;;  %p403_p5 = scmp.lt.s32.totalorder %s397_s21, %s397_s21 }
   0xb   :  { %p404_p6 = por %p403_p5, %p402_p4 }
   0xd   :  { %p405_p7 = pnand %p404_p6, %p398_p3 }
   0xf   :  { %408 = shalt.err (!%p405_p7)
}
  0x10   :  { %s436_s22 = smov 64   ;;  %s437_s23 = smov 4  }
  0x11   :  { %23 = dma.hbm_to_vmem [thread:$0]  %s495_s1, 1024, %s18_s13, [#allocation4], %s436_s22, %s436_s22, %s437_s23  }
  0x12   :  { %s438_s26 = smov [#allocation5]   ;;  %s409_s30 = scalar_lea.hbm %s496_s2, 1024 }
  0x13   :  { %s29_s27 = sshll.u32 %s438_s26, 4  ;;  %p410_p8 = scmp.ne.s32.totalorder %s496_s2, %s409_s30  ;;  %s30_s27 = int_to_ptr.vmem [resolvable:$true] %s29_s27 }
  0x14   :  { %p413_p9 = scmp.lt.u32.totalorder %s409_s30, %s496_s2 }
  0x16   :  { %p415_p10 = pnand %p413_p9, %p410_p8 }
  0x18   :  { %418 = shalt.err (!%p415_p10)
}
  0x19   :  { %s419_s8 = scalar_lea.vmem %s30_s27, 1024  ;;  %p424_p12 = scmp.lt.s32.totalorder %s30_s27, %s30_s27 }
  0x1a   :  { %p420_p11 = scmp.ne.s32.totalorder %s30_s27, %s419_s8  ;;  %p425_p13 = scmp.lt.s32.totalorder %s419_s8, %s419_s8 }
  0x1c   :  { %p426_p0 = por %p425_p13, %p424_p12 }
  0x1e   :  { %p427_p1 = pnand %p426_p0, %p420_p11 }
  0x20   :  { %430 = shalt.err (!%p427_p1)
}
  0x21   :  { %35 = dma.hbm_to_vmem [thread:$0]  %s496_s2, 1024, %s30_s27, [#allocation6], %s436_s22, %s436_s22, %s437_s23  }
  0x22   :  { %431 = dma.done.wait [#allocation4], 1024  }
  0x23   :  { %432 = vsyncadd [#allocation4], 4294966272 }
  0x24   :  { %433 = dma.done.wait [#allocation6], 1024  }
  0x25   :  { %434 = vsyncadd [#allocation6], 4294966272  ;;  %v439_v0 = vmov 0.0   ;;  %vm440_vm0 = vmmov 0   ;;  %v370_v1 = vld [vmem:[#allocation3] sm:$0xff]   ;;  %v371_v2 = vld [vmem:[#allocation3 + $0x8] sm:$0xff]  }
  0x26   :  { %324 = vmatprep.subr.bf16.mxu0 %v439_v0  ;;  %340 = vmatprep.mubr.msk.bf16.mxu0 %vm440_vm0, %v439_v0  ;;  %v372_v3 = vld [vmem:[#allocation3 + $0x10] sm:$0xff]   ;;  %v379_v4 = vld [vmem:[#allocation5] sm:$0xff]   ;;  %v373_v5 = vld [vmem:[#allocation3 + $0x18] sm:$0xff]  }
  0x27   :  { %344 = vmatprep.subr.bf16.mxu1 %v439_v0  ;;  %360 = vmatprep.mubr.msk.bf16.mxu1 %vm440_vm0, %v439_v0  ;;  %v380_v6 = vld [vmem:[#allocation5 + $0x8] sm:$0xff]   ;;  %v374_v7 = vld [vmem:[#allocation3 + $0x20] sm:$0xff]   ;;  %v381_v8 = vld [vmem:[#allocation5 + $0x10] sm:$0xff]  }
  0x28   :  { %325 = vmatpush3.bf16.msra.mxu0 %v370_v1  ;;  %345 = vmatpush3.bf16.msra.mxu1 %v379_v4  ;;  %v375_v9 = vld [vmem:[#allocation3 + $0x28] sm:$0xff]   ;;  %v382_v10 = vld [vmem:[#allocation5 + $0x18] sm:$0xff]   ;;  %v376_v11 = vld [vmem:[#allocation3 + $0x30] sm:$0xff]  }
  0x29   :  { %326 = vmatprep.subr.bf16.mxu0 %v439_v0  ;;  %346 = vmatprep.subr.bf16.mxu1 %v439_v0  ;;  %v383_v12 = vld [vmem:[#allocation5 + $0x20] sm:$0xff]   ;;  %v377_v13 = vld [vmem:[#allocation3 + $0x38] sm:$0xff]   ;;  %v384_v14 = vld [vmem:[#allocation5 + $0x28] sm:$0xff]  }
  0x2a   :  { %v378_v15 = vld [vmem:[%s494_s0] sm:$0xff]   ;;  %v385_v16 = vld [vmem:[#allocation5 + $0x30] sm:$0xff]   ;;  %v386_v17 = vld [vmem:[#allocation5 + $0x38] sm:$0xff]  }
  0x2c   :  { %327 = vmatpush3.bf16.msra.mxu0 %v371_v2  ;;  %347 = vmatpush3.bf16.msra.mxu1 %v380_v6 }
  0x2d   :  { %328 = vmatprep.subr.bf16.mxu0 %v439_v0  ;;  %348 = vmatprep.subr.bf16.mxu1 %v439_v0 }
  0x30   :  { %329 = vmatpush3.bf16.msra.mxu0 %v372_v3  ;;  %349 = vmatpush3.bf16.msra.mxu1 %v381_v8 }
  0x31   :  { %330 = vmatprep.subr.bf16.mxu0 %v439_v0  ;;  %350 = vmatprep.subr.bf16.mxu1 %v439_v0 }
  0x34   :  { %331 = vmatpush3.bf16.msra.mxu0 %v373_v5  ;;  %351 = vmatpush3.bf16.msra.mxu1 %v382_v10 }
  0x35   :  { %332 = vmatprep.subr.bf16.mxu0 %v439_v0  ;;  %352 = vmatprep.subr.bf16.mxu1 %v439_v0 }
  0x38   :  { %333 = vmatpush3.bf16.msra.mxu0 %v374_v7  ;;  %353 = vmatpush3.bf16.msra.mxu1 %v383_v12 }
  0x39   :  { %334 = vmatprep.subr.bf16.mxu0 %v439_v0  ;;  %354 = vmatprep.subr.bf16.mxu1 %v439_v0 }
  0x3c   :  { %335 = vmatpush3.bf16.msra.mxu0 %v375_v9  ;;  %355 = vmatpush3.bf16.msra.mxu1 %v384_v14 }
  0x3d   :  { %336 = vmatprep.subr.bf16.mxu0 %v439_v0  ;;  %356 = vmatprep.subr.bf16.mxu1 %v439_v0 }
  0x40   :  { %337 = vmatpush3.bf16.msra.mxu0 %v376_v11  ;;  %357 = vmatpush3.bf16.msra.mxu1 %v385_v16 }
  0x41   :  { %338 = vmatprep.subr.bf16.mxu0 %v439_v0  ;;  %358 = vmatprep.subr.bf16.mxu1 %v439_v0 }
  0x44   :  { %339 = vmatpush3.bf16.msra.mxu0 %v377_v13  ;;  %359 = vmatpush3.bf16.msra.mxu1 %v386_v17 }
  0x47   :  { %341 = vmatmul.mubr.bf16.vlgmr.msra.gmra.mrb[0].mxu0 %v378_v15 }
 0x11a   :  { %v155_v18 = vpop.f32.mrb[0].mxu0 }
 0x11b   :  { %v342_v19 = vpop.f32.mrb[1].mxu0  ;;  %v162_v21 = vmax.f32 %v155_v18, 0.0 }
 0x11c   :  { %v158_v20 = vpop.f32.mrb[2].mxu0 }
 0x11d   :  { %v163_v22 = vmax.f32 %v158_v20, 0.0  ;;  %v343_v23 = vpop.f32.mrb[3].mxu0 }
 0x11f   :  { %v166_v24 = vpack.c.bf16 %v163_v22, %v162_v21 }
 0x121   :  { %361 = vmatmul.mubr.bf16.vlgmr.msra.gmra.mrb[0].mxu1 %v166_v24 }
 0x1f4   :  { %v265_v25 = vpop.f32.mrb[0].mxu1 }
 0x1f5   :  { %281 = vst [vmem:[%s497_s3] sm:$0xff] %v265_v25  ;;  %v362_v26 = vpop.f32.mrb[1].mxu1 }
 0x1f6   :  { %v268_v27 = vpop.f32.mrb[2].mxu1 }
 0x1f7   :  { %282 = vst [vmem:[%s497_s3 + $0x8] sm:$0xff] %v268_v27  ;;  %v363_v28 = vpop.f32.mrb[3].mxu1 }
 0x1f8   :  { %287 = vsyncpa [#allocation4], 1 }
 0x1f9   :  { %288 = vsyncpa [#allocation6], 1 }

</bundles_post_ra>
